<compile_context>
chip_gen: v6e
topology: v6e:2x2x1
jax: 0.10.0
libtpu: 0.0.40
codegen_flags: <defaults>
</compile_context>

<pallas_src>
import functools
import jax
import jax.numpy as jnp
from jax import lax
from jax.experimental import pallas as pl
from jax.experimental.pallas import tpu as pltpu

NEG_SLOPE = 0.01          # F.leaky_relu default
_HID_DIMS = (10, 8, 6)    # fixed hidden widths from the PyTorch module


def _round_up(x, m):
    return ((x + m - 1) // m) * m


def _leaky_relu(h):
    return jnp.where(h > 0, h, NEG_SLOPE * h)


def ae_kernel(wc_ref, wr_ref, bc_ref, br_ref, x_ref, lat_ref, out_ref):
    """One batch tile through the full 8-layer autoencoder.

    wc_ref: (8, DP, DP) weights in (out, in) orientation -> h_new = W @ h
    wr_ref: (8, DP, DP) weights in (in, out) orientation -> row-major outputs
    bc_ref: (8, DP, 1)  biases as columns (broadcast over lanes)
    br_ref: (8, 1, DP)  biases as rows    (broadcast over sublanes)
    x_ref:  (TM, n_feat) input tile, natural batch-major layout
    lat_ref: (TM, n_lat) latent tile (batch-major)
    out_ref: (TM, n_feat) reconstruction tile (batch-major)
    """
    x = x_ref[...].astype(jnp.float32)          # (TM, n_feat)
    wc = wc_ref[...].astype(jnp.float32)        # (8, DP, DP)
    wr = wr_ref[...].astype(jnp.float32)        # (8, DP, DP)
    bc = bc_ref[...].astype(jnp.float32)        # (8, DP, 1)
    br = br_ref[...].astype(jnp.float32)        # (8, 1, DP)
    n_feat = x.shape[1]
    n_lat = lat_ref.shape[1]

    # encoder1: (DP, n_feat) . (TM, n_feat)^T -> (DP, TM), batch on lanes.
    h = lax.dot_general(wc[0, :, :n_feat], x, (((1,), (1,)), ((), ())),
                        preferred_element_type=jnp.float32) + bc[0]
    h = _leaky_relu(h)

    # encoder2, encoder3 (batch stays on lanes).
    for k in (1, 2):
        h = jnp.dot(wc[k], h, preferred_element_type=jnp.float32) + bc[k]
        h = _leaky_relu(h)

    # encoder4 -> latent (no activation).
    #   Batch-major copy for the output (A^T @ B: contract the feature axis
    #   of h with the transposed weight), column copy to feed the decoder.
    lat_row = lax.dot_general(h, wr[3], (((0,), (0,)), ((), ())),
                              preferred_element_type=jnp.float32) + br[3]
    lat_ref[...] = lat_row[:, :n_lat].astype(lat_ref.dtype)
    h = jnp.dot(wc[3], h, preferred_element_type=jnp.float32) + bc[3]

    # decoder1..decoder3.
    for k in (4, 5, 6):
        h = jnp.dot(wc[k], h, preferred_element_type=jnp.float32) + bc[k]
        h = _leaky_relu(h)

    # decoder4 (no activation): emit batch-major directly.
    out_row = lax.dot_general(h, wr[7], (((0,), (0,)), ((), ())),
                              preferred_element_type=jnp.float32) + br[7]
    out_ref[...] = out_row[:, :out_ref.shape[1]].astype(out_ref.dtype)


def init_ae_params(key, n_feat, n_lat, dtype=jnp.float32):
    """PyTorch-style init: U(-1/sqrt(fan_in), 1/sqrt(fan_in)).

    Returns list of (w, b) with w shaped (d_in, d_out), b shaped (1, d_out),
    i.e. y = x @ w + b (equivalent to nn.Linear's x @ W.T + b).
    """
    n_hid1, n_hid2, n_hid3 = _HID_DIMS
    dims = [
        (n_feat, n_hid1), (n_hid1, n_hid2), (n_hid2, n_hid3), (n_hid3, n_lat),
        (n_lat, n_hid3), (n_hid3, n_hid2), (n_hid2, n_hid1), (n_hid1, n_feat),
    ]
    params = []
    for (d_in, d_out) in dims:
        key, kw, kb = jax.random.split(key, 3)
        bound = 1.0 / (d_in ** 0.5)
        w = jax.random.uniform(kw, (d_in, d_out), dtype, -bound, bound)
        b = jax.random.uniform(kb, (1, d_out), dtype, -bound, bound)
        params.append((w, b))
    return params


def _pack_params(params, dp, dtype=jnp.float32):
    """Pack all layers into zero-padded resident stacks (both orientations)."""
    n_layers = len(params)
    wc = jnp.zeros((n_layers, dp, dp), dtype)   # (out, in):  h_new = W @ h
    wr = jnp.zeros((n_layers, dp, dp), dtype)   # (in, out):  out_row = h^T @ W^T
    bc = jnp.zeros((n_layers, dp, 1), dtype)
    br = jnp.zeros((n_layers, 1, dp), dtype)
    for k, (w, b) in enumerate(params):
        d_in, d_out = w.shape
        wc = wc.at[k, :d_out, :d_in].set(w.T.astype(dtype))
        wr = wr.at[k, :d_in, :d_out].set(w.astype(dtype))
        bc = bc.at[k, :d_out, 0].set(b[0].astype(dtype))
        br = br.at[k, 0, :d_out].set(b[0].astype(dtype))
    return wc, wr, bc, br


@functools.partial(jax.jit, static_argnames=("tile_m",))
def ae_forward(x, params, adj=None, inv_adj=None, *, tile_m=8192):
    """Returns (latent, reconstruction), matching AE.forward semantics."""
    del adj, inv_adj  # unused by the reference forward pass
    N, n_feat = x.shape
    n_lat = params[3][0].shape[1]
    dp = _round_up(max(n_feat, n_lat, *_HID_DIMS), 8)   # padded feature dim

    # Batch tile: big enough that each grid step moves >~1 MiB of HBM payload
    # (amortizes the ~0.35us per-step pipeline overhead), capped so the grid
    # keeps >=2 steps whenever N allows (both v7x TensorCores stay busy), and
    # a multiple of 128 so the in-kernel activations are lane-dense.
    tm = min(_round_up(tile_m, 128), _round_up(pl.cdiv(N, 2), 128))
    tm = max(tm, 128)
    grid = (pl.cdiv(N, tm),)   # last block may be partial; OOB rows are masked

    wc, wr, bc, br = _pack_params(params, dp)

    bytes_io = N * (2 * n_feat + n_lat) * x.dtype.itemsize + 4 * wc.size * 4
    lat, out = pl.pallas_call(
        ae_kernel,
        out_shape=(
            jax.ShapeDtypeStruct((N, n_lat), x.dtype),
            jax.ShapeDtypeStruct((N, n_feat), x.dtype),
        ),
        grid_spec=pltpu.PrefetchScalarGridSpec(
            num_scalar_prefetch=0,
            grid=grid,
            in_specs=[
                pl.BlockSpec(wc.shape, lambda i: (0, 0, 0)),   # resident params
                pl.BlockSpec(wr.shape, lambda i: (0, 0, 0)),
                pl.BlockSpec(bc.shape, lambda i: (0, 0, 0)),
                pl.BlockSpec(br.shape, lambda i: (0, 0, 0)),
                pl.BlockSpec((tm, n_feat), lambda i: (i, 0)),  # natural-layout x
            ],
            out_specs=[
                pl.BlockSpec((tm, n_lat), lambda i: (i, 0)),   # batch-major latent
                pl.BlockSpec((tm, n_feat), lambda i: (i, 0)),  # batch-major recon
            ],
        ),
        compiler_params=pltpu.CompilerParams(
            dimension_semantics=("parallel",),     # megacore-shardable batch axis
            vmem_limit_bytes=48 * 1024 * 1024),    # lane-padded (tm,16) buffers
        cost_estimate=pl.CostEstimate(
            flops=2 * 9 * dp * dp * N,
            bytes_accessed=bytes_io,
            transcendentals=0),
    )(wc, wr, bc, br, x)
    return lat, out


def ae_forward_ref(x, params):
    """Pure-JAX reference for correctness checking."""
    h = x.astype(jnp.float32)
    lat = None
    for idx, (w, b) in enumerate(params):
        h = h @ w.astype(jnp.float32) + b.astype(jnp.float32)[0]
        if idx == 3:
            lat = h
        if idx not in (3, 7):
            h = jnp.where(h > 0, h, NEG_SLOPE * h)
    return lat, h


if __name__ == "__main__":
    key = jax.random.PRNGKey(0)
    n_feat, n_hid, n_lat, dropout = 16, 32, 4, 0.0   # n_hid/dropout unused by AE
    kx, kp, kx2 = jax.random.split(key, 3)
    params = init_ae_params(kp, n_feat, n_lat)

    # Small case (matches the module's toy usage).
    N = 16
    x = jax.random.normal(kx, (N, n_feat), jnp.float32)
    adj = jnp.eye(N, dtype=jnp.float32)       # unused, signature parity
    inv_adj = jnp.eye(N, dtype=jnp.float32)   # unused, signature parity

    lat, recon = ae_forward(x, params, adj, inv_adj)
    jax.block_until_ready((lat, recon))
    lat_ref, recon_ref = ae_forward_ref(x, params)
    assert lat.shape == (N, n_lat) and recon.shape == (N, n_feat)
    assert jnp.allclose(lat, lat_ref, atol=1e-4, rtol=1e-4)
    assert jnp.allclose(recon, recon_ref, atol=1e-4, rtol=1e-4)

    # Second case: N not a multiple of the tile -> partial edge block and a
    # 2-step grid (exercises the OOB-masked writeback and the v7x megacore split).
    N2 = 300
    x2 = jax.random.normal(kx2, (N2, n_feat), jnp.float32)
    lat2, recon2 = ae_forward(x2, params)
    jax.block_until_ready((lat2, recon2))
    lat2_ref, recon2_ref = ae_forward_ref(x2, params)
    assert lat2.shape == (N2, n_lat) and recon2.shape == (N2, n_feat)
    assert jnp.allclose(lat2, lat2_ref, atol=1e-4, rtol=1e-4)
    assert jnp.allclose(recon2, recon2_ref, atol=1e-4, rtol=1e-4)

    print("KERNEL_OK")
</pallas_src>

<mosaic_0001>
module attributes {stable_mosaic.version = 11 : i64} {
  func.func @ae_kernel(%arg0: i32, %arg1: memref<8x16x16xf32, #tpu.memory_space<vmem>>, %arg2: memref<8x16x16xf32, #tpu.memory_space<vmem>>, %arg3: memref<8x16x1xf32, #tpu.memory_space<vmem>>, %arg4: memref<8x1x16xf32, #tpu.memory_space<vmem>>, %arg5: memref<128x16xf32, #tpu.memory_space<vmem>>, %arg6: memref<128x4xf32, #tpu.memory_space<vmem>>, %arg7: memref<128x16xf32, #tpu.memory_space<vmem>>) attributes {dimension_semantics = [#tpu.dimension_semantics<parallel>], iteration_bounds = array<i64: 1>, scalar_prefetch = 0 : i64, scratch_operands = 0 : i64, tpu.core_type = #tpu.core_type<tc>, window_params = [{pipeline_mode = #tpu.pipeline_mode<synchronous>, transform_indices = @transform_0, window_bounds = array<i64: 8, 16, 16>}, {pipeline_mode = #tpu.pipeline_mode<synchronous>, transform_indices = @transform_1, window_bounds = array<i64: 8, 16, 16>}, {pipeline_mode = #tpu.pipeline_mode<synchronous>, transform_indices = @transform_2, window_bounds = array<i64: 8, 16, 1>}, {pipeline_mode = #tpu.pipeline_mode<synchronous>, transform_indices = @transform_3, window_bounds = array<i64: 8, 1, 16>}, {transform_indices = @transform_4, window_bounds = array<i64: 128, 16>}, {transform_indices = @transform_5, window_bounds = array<i64: 128, 4>}, {transform_indices = @transform_6, window_bounds = array<i64: 128, 16>}]} {
    %c0 = arith.constant 0 : index
    %c0_0 = arith.constant 0 : index
    %0 = vector.load %arg5[%c0, %c0_0] : memref<128x16xf32, #tpu.memory_space<vmem>>, vector<128x16xf32>
    %c0_1 = arith.constant 0 : index
    %c0_2 = arith.constant 0 : index
    %c0_3 = arith.constant 0 : index
    %1 = vector.load %arg1[%c0_1, %c0_2, %c0_3] : memref<8x16x16xf32, #tpu.memory_space<vmem>>, vector<8x16x16xf32>
    %c0_4 = arith.constant 0 : index
    %c0_5 = arith.constant 0 : index
    %c0_6 = arith.constant 0 : index
    %2 = vector.load %arg2[%c0_4, %c0_5, %c0_6] : memref<8x16x16xf32, #tpu.memory_space<vmem>>, vector<8x16x16xf32>
    %c0_7 = arith.constant 0 : index
    %c0_8 = arith.constant 0 : index
    %c0_9 = arith.constant 0 : index
    %3 = vector.load %arg3[%c0_7, %c0_8, %c0_9] : memref<8x16x1xf32, #tpu.memory_space<vmem>>, vector<8x16x1xf32>
    %c0_10 = arith.constant 0 : index
    %c0_11 = arith.constant 0 : index
    %c0_12 = arith.constant 0 : index
    %4 = vector.load %arg4[%c0_10, %c0_11, %c0_12] : memref<8x1x16xf32, #tpu.memory_space<vmem>>, vector<8x1x16xf32>
    %5 = vector.extract_strided_slice %1 {offsets = [0, 0, 0], sizes = [1, 16, 16], strides = [1, 1, 1]} : vector<8x16x16xf32> to vector<1x16x16xf32>
    %6 = vector.shape_cast %5 : vector<1x16x16xf32> to vector<16x16xf32>
    %cst = arith.constant dense<0.000000e+00> : vector<16x128xf32>
    %7 = tpu.matmul %6, %0, %cst {dimension_numbers = #tpu.dot_dimension_numbers<[1], [1], [0], [0], [0, 0, 1, 0], [], []>} : vector<16x16xf32>, vector<128x16xf32>, vector<16x128xf32> -> vector<16x128xf32>
    %8 = vector.extract_strided_slice %3 {offsets = [0, 0, 0], sizes = [1, 16, 1], strides = [1, 1, 1]} : vector<8x16x1xf32> to vector<1x16x1xf32>
    %9 = vector.shape_cast %8 : vector<1x16x1xf32> to vector<16x1xf32>
    %10 = vector.broadcast %9 : vector<16x1xf32> to vector<16x128xf32>
    %11 = arith.addf %7, %10 : vector<16x128xf32>
    %cst_13 = arith.constant 0.000000e+00 : f32
    %12 = vector.broadcast %cst_13 : f32 to vector<16x128xf32>
    %13 = arith.cmpf ogt, %11, %12 : vector<16x128xf32>
    %cst_14 = arith.constant 0.00999999977 : f32
    %14 = vector.broadcast %cst_14 : f32 to vector<16x128xf32>
    %15 = arith.mulf %14, %11 : vector<16x128xf32>
    %16 = arith.select %13, %11, %15 : vector<16x128xi1>, vector<16x128xf32>
    %17 = vector.extract_strided_slice %1 {offsets = [1, 0, 0], sizes = [1, 16, 16], strides = [1, 1, 1]} : vector<8x16x16xf32> to vector<1x16x16xf32>
    %18 = vector.shape_cast %17 : vector<1x16x16xf32> to vector<16x16xf32>
    %cst_15 = arith.constant dense<0.000000e+00> : vector<16x128xf32>
    %19 = tpu.matmul %18, %16, %cst_15 {dimension_numbers = #tpu.dot_dimension_numbers<[1], [0], [0], [1], [0, 0, 1, 1], [], []>} : vector<16x16xf32>, vector<16x128xf32>, vector<16x128xf32> -> vector<16x128xf32>
    %20 = vector.extract_strided_slice %3 {offsets = [1, 0, 0], sizes = [1, 16, 1], strides = [1, 1, 1]} : vector<8x16x1xf32> to vector<1x16x1xf32>
    %21 = vector.shape_cast %20 : vector<1x16x1xf32> to vector<16x1xf32>
    %22 = vector.broadcast %21 : vector<16x1xf32> to vector<16x128xf32>
    %23 = arith.addf %19, %22 : vector<16x128xf32>
    %cst_16 = arith.constant 0.000000e+00 : f32
    %24 = vector.broadcast %cst_16 : f32 to vector<16x128xf32>
    %25 = arith.cmpf ogt, %23, %24 : vector<16x128xf32>
    %cst_17 = arith.constant 0.00999999977 : f32
    %26 = vector.broadcast %cst_17 : f32 to vector<16x128xf32>
    %27 = arith.mulf %26, %23 : vector<16x128xf32>
    %28 = arith.select %25, %23, %27 : vector<16x128xi1>, vector<16x128xf32>
    %29 = vector.extract_strided_slice %1 {offsets = [2, 0, 0], sizes = [1, 16, 16], strides = [1, 1, 1]} : vector<8x16x16xf32> to vector<1x16x16xf32>
    %30 = vector.shape_cast %29 : vector<1x16x16xf32> to vector<16x16xf32>
    %cst_18 = arith.constant dense<0.000000e+00> : vector<16x128xf32>
    %31 = tpu.matmul %30, %28, %cst_18 {dimension_numbers = #tpu.dot_dimension_numbers<[1], [0], [0], [1], [0, 0, 1, 1], [], []>} : vector<16x16xf32>, vector<16x128xf32>, vector<16x128xf32> -> vector<16x128xf32>
    %32 = vector.extract_strided_slice %3 {offsets = [2, 0, 0], sizes = [1, 16, 1], strides = [1, 1, 1]} : vector<8x16x1xf32> to vector<1x16x1xf32>
    %33 = vector.shape_cast %32 : vector<1x16x1xf32> to vector<16x1xf32>
    %34 = vector.broadcast %33 : vector<16x1xf32> to vector<16x128xf32>
    %35 = arith.addf %31, %34 : vector<16x128xf32>
    %cst_19 = arith.constant 0.000000e+00 : f32
    %36 = vector.broadcast %cst_19 : f32 to vector<16x128xf32>
    %37 = arith.cmpf ogt, %35, %36 : vector<16x128xf32>
    %cst_20 = arith.constant 0.00999999977 : f32
    %38 = vector.broadcast %cst_20 : f32 to vector<16x128xf32>
    %39 = arith.mulf %38, %35 : vector<16x128xf32>
    %40 = arith.select %37, %35, %39 : vector<16x128xi1>, vector<16x128xf32>
    %41 = vector.extract_strided_slice %2 {offsets = [3, 0, 0], sizes = [1, 16, 16], strides = [1, 1, 1]} : vector<8x16x16xf32> to vector<1x16x16xf32>
    %42 = vector.shape_cast %41 : vector<1x16x16xf32> to vector<16x16xf32>
    %cst_21 = arith.constant dense<0.000000e+00> : vector<128x16xf32>
    %43 = tpu.matmul %40, %42, %cst_21 {dimension_numbers = #tpu.dot_dimension_numbers<[0], [0], [1], [1], [0, 1, 1, 1], [], []>} : vector<16x128xf32>, vector<16x16xf32>, vector<128x16xf32> -> vector<128x16xf32>
    %44 = vector.extract_strided_slice %4 {offsets = [3, 0, 0], sizes = [1, 1, 16], strides = [1, 1, 1]} : vector<8x1x16xf32> to vector<1x1x16xf32>
    %45 = vector.shape_cast %44 : vector<1x1x16xf32> to vector<1x16xf32>
    %46 = vector.broadcast %45 : vector<1x16xf32> to vector<128x16xf32>
    %47 = arith.addf %43, %46 : vector<128x16xf32>
    %48 = vector.extract_strided_slice %47 {offsets = [0, 0], sizes = [128, 4], strides = [1, 1]} : vector<128x16xf32> to vector<128x4xf32>
    %c0_22 = arith.constant 0 : index
    %c0_23 = arith.constant 0 : index
    %49 = vector.load %arg6[%c0_22, %c0_23] : memref<128x4xf32, #tpu.memory_space<vmem>>, vector<128x4xf32>
    tpu.vector_store %arg6[%c0_22, %c0_23], %48 {strides = array<i32>} : memref<128x4xf32, #tpu.memory_space<vmem>>, vector<128x4xf32>,
    %50 = vector.extract_strided_slice %1 {offsets = [3, 0, 0], sizes = [1, 16, 16], strides = [1, 1, 1]} : vector<8x16x16xf32> to vector<1x16x16xf32>
    %51 = vector.shape_cast %50 : vector<1x16x16xf32> to vector<16x16xf32>
    %cst_24 = arith.constant dense<0.000000e+00> : vector<16x128xf32>
    %52 = tpu.matmul %51, %40, %cst_24 {dimension_numbers = #tpu.dot_dimension_numbers<[1], [0], [0], [1], [0, 0, 1, 1], [], []>} : vector<16x16xf32>, vector<16x128xf32>, vector<16x128xf32> -> vector<16x128xf32>
    %53 = vector.extract_strided_slice %3 {offsets = [3, 0, 0], sizes = [1, 16, 1], strides = [1, 1, 1]} : vector<8x16x1xf32> to vector<1x16x1xf32>
    %54 = vector.shape_cast %53 : vector<1x16x1xf32> to vector<16x1xf32>
    %55 = vector.broadcast %54 : vector<16x1xf32> to vector<16x128xf32>
    %56 = arith.addf %52, %55 : vector<16x128xf32>
    %57 = vector.extract_strided_slice %1 {offsets = [4, 0, 0], sizes = [1, 16, 16], strides = [1, 1, 1]} : vector<8x16x16xf32> to vector<1x16x16xf32>
    %58 = vector.shape_cast %57 : vector<1x16x16xf32> to vector<16x16xf32>
    %cst_25 = arith.constant dense<0.000000e+00> : vector<16x128xf32>
    %59 = tpu.matmul %58, %56, %cst_25 {dimension_numbers = #tpu.dot_dimension_numbers<[1], [0], [0], [1], [0, 0, 1, 1], [], []>} : vector<16x16xf32>, vector<16x128xf32>, vector<16x128xf32> -> vector<16x128xf32>
    %60 = vector.extract_strided_slice %3 {offsets = [4, 0, 0], sizes = [1, 16, 1], strides = [1, 1, 1]} : vector<8x16x1xf32> to vector<1x16x1xf32>
    %61 = vector.shape_cast %60 : vector<1x16x1xf32> to vector<16x1xf32>
    %62 = vector.broadcast %61 : vector<16x1xf32> to vector<16x128xf32>
    %63 = arith.addf %59, %62 : vector<16x128xf32>
    %cst_26 = arith.constant 0.000000e+00 : f32
    %64 = vector.broadcast %cst_26 : f32 to vector<16x128xf32>
    %65 = arith.cmpf ogt, %63, %64 : vector<16x128xf32>
    %cst_27 = arith.constant 0.00999999977 : f32
    %66 = vector.broadcast %cst_27 : f32 to vector<16x128xf32>
    %67 = arith.mulf %66, %63 : vector<16x128xf32>
    %68 = arith.select %65, %63, %67 : vector<16x128xi1>, vector<16x128xf32>
    %69 = vector.extract_strided_slice %1 {offsets = [5, 0, 0], sizes = [1, 16, 16], strides = [1, 1, 1]} : vector<8x16x16xf32> to vector<1x16x16xf32>
    %70 = vector.shape_cast %69 : vector<1x16x16xf32> to vector<16x16xf32>
    %cst_28 = arith.constant dense<0.000000e+00> : vector<16x128xf32>
    %71 = tpu.matmul %70, %68, %cst_28 {dimension_numbers = #tpu.dot_dimension_numbers<[1], [0], [0], [1], [0, 0, 1, 1], [], []>} : vector<16x16xf32>, vector<16x128xf32>, vector<16x128xf32> -> vector<16x128xf32>
    %72 = vector.extract_strided_slice %3 {offsets = [5, 0, 0], sizes = [1, 16, 1], strides = [1, 1, 1]} : vector<8x16x1xf32> to vector<1x16x1xf32>
    %73 = vector.shape_cast %72 : vector<1x16x1xf32> to vector<16x1xf32>
    %74 = vector.broadcast %73 : vector<16x1xf32> to vector<16x128xf32>
    %75 = arith.addf %71, %74 : vector<16x128xf32>
    %cst_29 = arith.constant 0.000000e+00 : f32
    %76 = vector.broadcast %cst_29 : f32 to vector<16x128xf32>
    %77 = arith.cmpf ogt, %75, %76 : vector<16x128xf32>
    %cst_30 = arith.constant 0.00999999977 : f32
    %78 = vector.broadcast %cst_30 : f32 to vector<16x128xf32>
    %79 = arith.mulf %78, %75 : vector<16x128xf32>
    %80 = arith.select %77, %75, %79 : vector<16x128xi1>, vector<16x128xf32>
    %81 = vector.extract_strided_slice %1 {offsets = [6, 0, 0], sizes = [1, 16, 16], strides = [1, 1, 1]} : vector<8x16x16xf32> to vector<1x16x16xf32>
    %82 = vector.shape_cast %81 : vector<1x16x16xf32> to vector<16x16xf32>
    %cst_31 = arith.constant dense<0.000000e+00> : vector<16x128xf32>
    %83 = tpu.matmul %82, %80, %cst_31 {dimension_numbers = #tpu.dot_dimension_numbers<[1], [0], [0], [1], [0, 0, 1, 1], [], []>} : vector<16x16xf32>, vector<16x128xf32>, vector<16x128xf32> -> vector<16x128xf32>
    %84 = vector.extract_strided_slice %3 {offsets = [6, 0, 0], sizes = [1, 16, 1], strides = [1, 1, 1]} : vector<8x16x1xf32> to vector<1x16x1xf32>
    %85 = vector.shape_cast %84 : vector<1x16x1xf32> to vector<16x1xf32>
    %86 = vector.broadcast %85 : vector<16x1xf32> to vector<16x128xf32>
    %87 = arith.addf %83, %86 : vector<16x128xf32>
    %cst_32 = arith.constant 0.000000e+00 : f32
    %88 = vector.broadcast %cst_32 : f32 to vector<16x128xf32>
    %89 = arith.cmpf ogt, %87, %88 : vector<16x128xf32>
    %cst_33 = arith.constant 0.00999999977 : f32
    %90 = vector.broadcast %cst_33 : f32 to vector<16x128xf32>
    %91 = arith.mulf %90, %87 : vector<16x128xf32>
    %92 = arith.select %89, %87, %91 : vector<16x128xi1>, vector<16x128xf32>
    %93 = vector.extract_strided_slice %2 {offsets = [7, 0, 0], sizes = [1, 16, 16], strides = [1, 1, 1]} : vector<8x16x16xf32> to vector<1x16x16xf32>
    %94 = vector.shape_cast %93 : vector<1x16x16xf32> to vector<16x16xf32>
    %cst_34 = arith.constant dense<0.000000e+00> : vector<128x16xf32>
    %95 = tpu.matmul %92, %94, %cst_34 {dimension_numbers = #tpu.dot_dimension_numbers<[0], [0], [1], [1], [0, 1, 1, 1], [], []>} : vector<16x128xf32>, vector<16x16xf32>, vector<128x16xf32> -> vector<128x16xf32>
    %96 = vector.extract_strided_slice %4 {offsets = [7, 0, 0], sizes = [1, 1, 16], strides = [1, 1, 1]} : vector<8x1x16xf32> to vector<1x1x16xf32>
    %97 = vector.shape_cast %96 : vector<1x1x16xf32> to vector<1x16xf32>
    %98 = vector.broadcast %97 : vector<1x16xf32> to vector<128x16xf32>
    %99 = arith.addf %95, %98 : vector<128x16xf32>
    %c0_35 = arith.constant 0 : index
    %c0_36 = arith.constant 0 : index
    %100 = vector.load %arg7[%c0_35, %c0_36] : memref<128x16xf32, #tpu.memory_space<vmem>>, vector<128x16xf32>
    tpu.vector_store %arg7[%c0_35, %c0_36], %99 {strides = array<i32>} : memref<128x16xf32, #tpu.memory_space<vmem>>, vector<128x16xf32>,
    return
  }
  func.func @transform_0(%arg0: i32) -> (i32, i32, i32) {
    %c0_i32 = arith.constant 0 : i32
    %c0_i32_0 = arith.constant 0 : i32
    %c0_i32_1 = arith.constant 0 : i32
    %c0_i32_2 = arith.constant 0 : i32
    return %c0_i32, %c0_i32_0, %c0_i32_1 : i32, i32, i32
  }
  func.func @transform_1(%arg0: i32) -> (i32, i32, i32) {
    %c0_i32 = arith.constant 0 : i32
    %c0_i32_0 = arith.constant 0 : i32
    %c0_i32_1 = arith.constant 0 : i32
    %c0_i32_2 = arith.constant 0 : i32
    return %c0_i32, %c0_i32_0, %c0_i32_1 : i32, i32, i32
  }
  func.func @transform_2(%arg0: i32) -> (i32, i32, i32) {
    %c0_i32 = arith.constant 0 : i32
    %c0_i32_0 = arith.constant 0 : i32
    %c0_i32_1 = arith.constant 0 : i32
    %c0_i32_2 = arith.constant 0 : i32
    return %c0_i32, %c0_i32_0, %c0_i32_1 : i32, i32, i32
  }
  func.func @transform_3(%arg0: i32) -> (i32, i32, i32) {
    %c0_i32 = arith.constant 0 : i32
    %c0_i32_0 = arith.constant 0 : i32
    %c0_i32_1 = arith.constant 0 : i32
    %c0_i32_2 = arith.constant 0 : i32
    return %c0_i32, %c0_i32_0, %c0_i32_1 : i32, i32, i32
  }
  func.func @transform_4(%arg0: i32) -> (i32, i32) {
    %c0_i32 = arith.constant 0 : i32
    %c0_i32_0 = arith.constant 0 : i32
    return %arg0, %c0_i32 : i32, i32
  }
  func.func @transform_5(%arg0: i32) -> (i32, i32) {
    %c0_i32 = arith.constant 0 : i32
    %c0_i32_0 = arith.constant 0 : i32
    return %arg0, %c0_i32 : i32, i32
  }
  func.func @transform_6(%arg0: i32) -> (i32, i32) {
    %c0_i32 = arith.constant 0 : i32
    %c0_i32_0 = arith.constant 0 : i32
    return %arg0, %c0_i32 : i32, i32
  }
}

</mosaic_0001>

<bundles_post_ra>
// kernel: ae_forward.1
= control target key start
LH: loop header
LB: loop body
LE: loop exit
PB: predicated region body
PF: predicated region fallthrough
CT: control target
= control target key end

     0   :  { %12 = vsyncpa [#allocation4], 0  ;;  %vm83_vm0 = vcmask 130048   ;;  %v1659_v2 = vmov 0   ;;  %vm644_vm7 = vcmask 31744   ;;  %s1951_s0 = inlined_call_operand.vmem [shape: f32[8,16,16], index: 0, kind: input, shape index: {}]   ;;  %s1952_s1 = inlined_call_operand.vmem [shape: f32[8,16,16], index: 1, kind: input, shape index: {}]   ;;  %s1953_s2 = inlined_call_operand.vmem [shape: f32[8,16,1], index: 2, kind: input, shape index: {}]   ;;  %s1954_s3 = inlined_call_operand.vmem [shape: f32[8,1,16], index: 3, kind: input, shape index: {}]   ;;  %s1955_s4 = inlined_call_operand.vmem [shape: f32[16,16], index: 4, kind: input, shape index: {}]   ;;  %s1956_s5 = inlined_call_operand.vmem [shape: f32[16,4], index: 5, kind: output, shape index: {0}]   ;;  %s1957_s6 = inlined_call_operand.hbm [shape: f32[16,16], index: 6, kind: output, shape index: {1}]  }
   0x1   :  { %v38_v0 = vld [vmem:[%s1955_s4 + $0x78] sm:$0xff]  ;;  %v37_v1 = vld [vmem:[%s1955_s4 + $0x70] sm:$0xff]  ;;  %1635 = vset.pattern.permute.xlu0 %v1659_v2  ;;  %1636 = vset.pattern.permute.xlu1 %v1659_v2  ;;  %v36_v3 = vld [vmem:[%s1955_s4 + $0x68] sm:$0xff] }
   0x2   :  { %1493 = vmatprep.subr.msk.mxu0 %vm83_vm0, %v38_v0  ;;  %v39_v4 = vld [vmem:[%s1951_s0] sm:$0xff]  ;;  %v58_v5 = vld [vmem:[%s1953_s2 + $0x8] sm:$0xff]  ;;  %v34_v8 = vld [vmem:[%s1955_s4 + $0x58] sm:$0xff] }
   0x3   :  { %1494 = vmatpush3.xpose.msk.msra.mxu0 %vm83_vm0, %v38_v0  ;;  %1525 = vmatprep.mubr.msk.f32.mxu0 %vm83_vm0, %v39_v4  ;;  %v35_v6 = vld [vmem:[%s1955_s4 + $0x60] sm:$0xff]  ;;  %v33_v10 = vld [vmem:[%s1955_s4 + $0x50] sm:$0xff]  ;;  %v32_v11 = vld [vmem:[%s1955_s4 + $0x48] sm:$0xff] }
   0x4   :  { %1495 = vmatprep.subr.msk.mxu0 %vm83_vm0, %v37_v1  ;;  %80 = vperm.xlu0 %1635, %v58_v5   ;;  %v57_v7 = vld [vmem:[%s1953_s2] sm:$0xff]  ;;  %v30_v13 = vld [vmem:[%s1955_s4 + $0x38] sm:$0xff]  ;;  %v29_v14 = vld [vmem:[%s1955_s4 + $0x30] sm:$0xff] }
   0x5   :  { %v61_v9 = vld [vmem:[%s1953_s2 + $0x20] sm:$0xff]  ;;  %v28_v15 = vld [vmem:[%s1955_s4 + $0x28] sm:$0xff]  ;;  %v26_v17 = vld [vmem:[%s1955_s4 + $0x18] sm:$0xff] }
   0x6   :  { %v31_v12 = vld [vmem:[%s1955_s4 + $0x40] sm:$0xff]  ;;  %v25_v18 = vld [vmem:[%s1955_s4 + $0x10] sm:$0xff]  ;;  %v24_v19 = vld [vmem:[%s1955_s4 + $0x8] sm:$0xff] }
   0x7   :  { %1496 = vmatpush3.xpose.msk.msra.mxu0 %vm83_vm0, %v37_v1  ;;  %v27_v16 = vld [vmem:[%s1955_s4 + $0x20] sm:$0xff]  ;;  %v40_v21 = vld [vmem:[%s1951_s0 + $0x8] sm:$0xff]  ;;  %v41_v22 = vld [vmem:[%s1951_s0 + $0x10] sm:$0xff] }
   0x8   :  { %1497 = vmatprep.subr.msk.mxu0 %vm83_vm0, %v36_v3  ;;  %75 = vperm.xlu0 %1635, %v57_v7   ;;  %v23_v20 = vld [vmem:[%s1955_s4] sm:$0xff]  ;;  %v60_v23 = vld [vmem:[%s1953_s2 + $0x18] sm:$0xff]  ;;  %v59_v24 = vld [vmem:[%s1953_s2 + $0x10] sm:$0xff] }
   0x9   :  { %1532 = vmatprep.mubr.msk.f32.mxu1 %vm83_vm0, %v41_v22  ;;  %226 = vperm.xlu1 %1636, %v60_v23   ;;  %v62_v25 = vld [vmem:[%s1953_s2 + $0x28] sm:$0xff]  ;;  %v64_v26 = vld [vmem:[%s1953_s2 + $0x38] sm:$0xff]  ;;  %v63_v27 = vld [vmem:[%s1953_s2 + $0x30] sm:$0xff] }
   0xa   :  { %v66_v28 = vld [vmem:[%s1953_s2 + $0x48] sm:$0xff]  ;;  %v65_v29 = vld [vmem:[%s1953_s2 + $0x40] sm:$0xff]  ;;  %v68_v30 = vld [vmem:[%s1953_s2 + $0x58] sm:$0xff] }
   0xb   :  { %1498 = vmatpush3.xpose.msk.msra.mxu0 %vm83_vm0, %v36_v3  ;;  %v67_v31 = vld [vmem:[%s1953_s2 + $0x50] sm:$0xff]  ;;  %v69_v32 = vld [vmem:[%s1953_s2 + $0x60] sm:$0xff]  ;;  %v70_v33 = vld [vmem:[%s1953_s2 + $0x68] sm:$0xff] }
   0xc   :  { %1499 = vmatprep.subr.msk.mxu0 %vm83_vm0, %v35_v6  ;;  %318 = vperm.xlu0 %1635, %v61_v9   ;;  %v42_v44 = vld [vmem:[%s1951_s0 + $0x18] sm:$0xff]  ;;  %v43_v45 = vld [vmem:[%s1951_s0 + $0x20] sm:$0xff]  ;;  %v44_v56 = vld [vmem:[%s1951_s0 + $0x28] sm:$0xff] }
   0xd   :  { %221 = vperm.xlu1 %1636, %v59_v24   ;;  %v54_v57 = vld [vmem:[%s1952_s1 + $0x38] sm:$0xff]  ;;  %v53_v58 = vld [vmem:[%s1952_s1 + $0x30] sm:$0xff]  ;;  %v47_v23 = vld [vmem:[%s1951_s0 + $0x40] sm:$0xff] }
   0xe   :  { %v46_v22 = vld [vmem:[%s1951_s0 + $0x38] sm:$0xff]  ;;  %v1373_v24 = vld [vmem:[%s1954_s3 + $0x3] ss:$0 sm:$0xff] }
   0xf   :  { %1500 = vmatpush3.xpose.msk.msra.mxu0 %vm83_vm0, %v35_v6 }
  0x10   :  { %1501 = vmatprep.subr.msk.mxu0 %vm83_vm0, %v34_v8 }
  0x11   :  { %323 = vperm.xlu1 %1636, %v62_v25  }
  0x13   :  { %1502 = vmatpush3.xpose.msk.msra.mxu0 %vm83_vm0, %v34_v8 }
  0x14   :  { %1503 = vmatprep.subr.msk.mxu0 %vm83_vm0, %v33_v10 }
  0x15   :  { %668 = vperm.xlu1 %1636, %v64_v26  }
  0x17   :  { %1504 = vmatpush3.xpose.msk.msra.mxu0 %vm83_vm0, %v33_v10 }
  0x18   :  { %1505 = vmatprep.subr.msk.mxu0 %vm83_vm0, %v32_v11 }
  0x19   :  { %663 = vperm.xlu1 %1636, %v63_v27  }
  0x1b   :  { %1506 = vmatpush3.xpose.msk.msra.mxu0 %vm83_vm0, %v32_v11 }
  0x1c   :  { %1507 = vmatprep.subr.msk.mxu0 %vm83_vm0, %v31_v12 }
  0x1d   :  { %759 = vperm.xlu1 %1636, %v66_v28  }
  0x1f   :  { %1508 = vmatpush3.xpose.msk.msra.mxu0 %vm83_vm0, %v31_v12 }
  0x20   :  { %1509 = vmatprep.subr.msk.mxu0 %vm83_vm0, %v30_v13 }
  0x21   :  { %754 = vperm.xlu1 %1636, %v65_v29  }
  0x23   :  { %1510 = vmatpush3.xpose.msk.msra.mxu0 %vm83_vm0, %v30_v13 }
  0x24   :  { %1511 = vmatprep.subr.msk.mxu0 %vm83_vm0, %v29_v14 }
  0x25   :  { %856 = vperm.xlu1 %1636, %v68_v30  }
  0x27   :  { %1512 = vmatpush3.xpose.msk.msra.mxu0 %vm83_vm0, %v29_v14 }
  0x28   :  { %1513 = vmatprep.subr.msk.mxu0 %vm83_vm0, %v28_v15 }
  0x29   :  { %851 = vperm.xlu1 %1636, %v67_v31  }
  0x2b   :  { %1514 = vmatpush3.xpose.msk.msra.mxu0 %vm83_vm0, %v28_v15 }
  0x2c   :  { %1515 = vmatprep.subr.msk.mxu0 %vm83_vm0, %v27_v16 }
  0x2d   :  { %948 = vperm.xlu1 %1636, %v69_v32  }
  0x2f   :  { %1516 = vmatpush3.xpose.msk.msra.mxu0 %vm83_vm0, %v27_v16 }
  0x30   :  { %1517 = vmatprep.subr.msk.mxu0 %vm83_vm0, %v26_v17 }
  0x31   :  { %953 = vperm.xlu1 %1636, %v70_v33  }
  0x33   :  { %1518 = vmatpush3.xpose.msk.msra.mxu0 %vm83_vm0, %v26_v17 }
  0x34   :  { %1519 = vmatprep.subr.msk.mxu0 %vm83_vm0, %v25_v18 }
  0x37   :  { %1520 = vmatpush3.xpose.msk.msra.mxu0 %vm83_vm0, %v25_v18 }
  0x38   :  { %1521 = vmatprep.subr.msk.mxu0 %vm83_vm0, %v24_v19 }
  0x3b   :  { %1522 = vmatpush3.xpose.msk.msra.mxu0 %vm83_vm0, %v24_v19 }
  0x3c   :  { %1523 = vmatprep.subr.msk.mxu0 %vm83_vm0, %v23_v20 }
  0x3f   :  { %1524 = vmatpush3.xpose.msk.msra.mxu0 %vm83_vm0, %v23_v20  ;;  %v45_v20 = vld [vmem:[%s1951_s0 + $0x30] sm:$0xff] }
  0x40   :  { %1542 = vmatprep.subr.mxu0 %v54_v57 }
  0x42   :  { %1526 = vmatmul.mubr.msk.f32.vlgmr.msra.gmra.mxu0 %vm83_vm0, %v40_v21 }
  0x43   :  { %1543 = vmatpush3.msra.mxu0 %v54_v57 }
  0x44   :  { %1544 = vmatprep.subr.mxu0 %v53_v58 }
  0x45   :  { %1545 = vmatpush3.msra.mxu0 %v53_v58 }
  0x7f   :  { %v81_v34 = vpop.permute.xlu0 %80 }
  0x83   :  { %v76_v37 = vpop.permute.xlu0 %75 }
  0x84   :  { %v227_v46 = vpop.permute.xlu1 %226 }
  0x87   :  { %v319_v62 = vpop.permute.xlu0 %318 }
  0x88   :  { %v222_v49 = vpop.permute.xlu1 %221 }
  0x8c   :  { %v324_v59 = vpop.permute.xlu1 %323 }
 0x102   :  { %v1527_v35 = vpop.f32.mrf.mxu0 }
 0x103   :  { %v210_v36 = vadd.f32 %v1527_v35, %v81_v34 }
 0x104   :  { %v204_v38 = vpop.f32.mrf.mxu0 }
 0x105   :  { %v205_v39 = vadd.f32 %v204_v38, %v76_v37  ;;  %vm214_vm1 = vcmp.gt.f32.partialorder %v210_v36, 0.0  ;;  %v216_v40 = vmul.f32 0.01, %v210_v36 }
 0x107   :  { %v215_v41 = vmul.f32 0.01, %v205_v39  ;;  %v218_v42 = vsel %vm214_vm1, %v210_v36, %v216_v40  ;;  %vm213_vm2 = vcmp.gt.f32.partialorder %v205_v39, 0.0 }
 0x108   :  { %1528 = vmatprep.subr.mxu1 %v218_v42 }
 0x109   :  { %1529 = vmatpush3.msra.mxu1 %v218_v42  ;;  %v217_v43 = vsel %vm213_vm2, %v205_v39, %v215_v41 }
 0x10a   :  { %1530 = vmatprep.subr.mxu1 %v217_v43 }
 0x10b   :  { %1531 = vmatpush3.msra.mxu1 %v217_v43  ;;  %v669_v43 = vpop.permute.xlu1 %668 }
 0x10c   :  { %1533 = vmatmul.mubr.msk.f32.vlgmr.msra.gmra.mxu1 %vm83_vm0, %v42_v44 }
 0x10d   :  { %1539 = vmatprep.mubr.msk.f32.mxu1 %vm83_vm0, %v43_v45 }
 0x1cc   :  { %v1534_v47 = vpop.f32.mrf.mxu1 }
 0x1cd   :  { %v307_v48 = vadd.f32 %v1534_v47, %v227_v46 }
 0x1ce   :  { %v301_v50 = vpop.f32.mrf.mxu1 }
 0x1cf   :  { %v313_v51 = vmul.f32 0.01, %v307_v48  ;;  %v302_v52 = vadd.f32 %v301_v50, %v222_v49  ;;  %vm311_vm3 = vcmp.gt.f32.partialorder %v307_v48, 0.0 }
 0x1d1   :  { %v312_v53 = vmul.f32 0.01, %v302_v52  ;;  %v315_v54 = vsel %vm311_vm3, %v307_v48, %v313_v51  ;;  %vm310_vm4 = vcmp.gt.f32.partialorder %v302_v52, 0.0  ;;  %v664_v48 = vpop.permute.xlu1 %663  ;;  %v48_v51 = vld [vmem:[%s1951_s0 + $0x48] sm:$0xff] }
 0x1d2   :  { %1535 = vmatprep.subr.mxu1 %v315_v54 }
 0x1d3   :  { %1536 = vmatpush3.msra.mxu1 %v315_v54  ;;  %v314_v55 = vsel %vm310_vm4, %v302_v52, %v312_v53  ;;  %v49_v52 = vld [vmem:[%s1951_s0 + $0x50] sm:$0xff] }
 0x1d4   :  { %1537 = vmatprep.subr.mxu1 %v314_v55 }
 0x1d5   :  { %1538 = vmatpush3.msra.mxu1 %v314_v55  ;;  %v760_v53 = vpop.permute.xlu1 %759 }
 0x1d6   :  { %1540 = vmatmul.mubr.msk.f32.vlgmr.msra.gmra.mxu1 %vm83_vm0, %v44_v56  ;;  %1626 = vmatprep.subr.mxu1 %v54_v57 }
 0x1d7   :  { %1628 = vmatpush3.msra.mxu1 %v54_v57 }
 0x1d8   :  { %1627 = vmatprep.subr.mxu1 %v53_v58 }
 0x1d9   :  { %1629 = vmatpush3.msra.mxu1 %v53_v58  ;;  %v755_v56 = vpop.permute.xlu1 %754 }
 0x296   :  { %v1541_v60 = vpop.f32.mrf.mxu1 }
 0x297   :  { %v404_v61 = vadd.f32 %v1541_v60, %v324_v59 }
 0x298   :  { %v398_v63 = vpop.f32.mrf.mxu1 }
 0x299   :  { %v410_v0 = vmul.f32 0.01, %v404_v61  ;;  %v399_v1 = vadd.f32 %v398_v63, %v319_v62  ;;  %vm408_vm5 = vcmp.gt.f32.partialorder %v404_v61, 0.0  ;;  %v50_v63 = vld [vmem:[%s1951_s0 + $0x58] sm:$0xff] }
 0x29b   :  { %v409_v2 = vmul.f32 0.01, %v399_v1  ;;  %v412_v3 = vsel %vm408_vm5, %v404_v61, %v410_v0  ;;  %vm407_vm6 = vcmp.gt.f32.partialorder %v399_v1, 0.0  ;;  %v51_v0 = vld [vmem:[%s1951_s0 + $0x60] sm:$0xff] }
 0x29c   :  { %1570 = vmatprep.subr.mxu1 %v412_v3 }
 0x29d   :  { %v411_v4 = vsel %vm407_vm6, %v399_v1, %v409_v2  ;;  %v857_v1 = vpop.permute.xlu1 %856 }
 0x29e   :  { %419 = vxpose.xlu0.b32.start [1/2] (short) %v411_v4, 128 }
 0x2a2   :  { %420 = vxpose.xlu0.b32.end [2/2] (short) %v412_v3, 128 }
 0x31a   :  { %v435_v5 = vpop.trf.xlu0 }
 0x31b   :  { %1546 = vmatprep.mubr.msk.f32.mxu0 %vm83_vm0, %v435_v5 }
 0x31e   :  { %v436_v6 = vpop.trf.xlu0 }
 0x31f   :  { %1547 = vmatmul.mubr.msk.f32.vlgmr.msra.gmra.mxu0 %vm83_vm0, %v436_v6 }
 0x322   :  { %v437_v7 = vpop.trf.xlu0 }
 0x323   :  { %1549 = vmatprep.mubr.msk.f32.mxu0 %vm83_vm0, %v437_v7 }
 0x326   :  { %v438_v8 = vpop.trf.xlu0 }
 0x327   :  { %1550 = vmatmul.mubr.msk.f32.gmra.mxu0 %vm83_vm0, %v438_v8 }
 0x32a   :  { %v439_v9 = vpop.trf.xlu0 }
 0x32b   :  { %1552 = vmatprep.mubr.msk.f32.mxu0 %vm83_vm0, %v439_v9 }
 0x32e   :  { %v440_v10 = vpop.trf.xlu0 }
 0x32f   :  { %1553 = vmatmul.mubr.msk.f32.gmra.mxu0 %vm83_vm0, %v440_v10 }
 0x332   :  { %v441_v11 = vpop.trf.xlu0 }
 0x333   :  { %1555 = vmatprep.mubr.msk.f32.mxu1 %vm83_vm0, %v441_v11  ;;  %v52_v11 = vld [vmem:[%s1951_s0 + $0x68] sm:$0xff] }
 0x336   :  { %v442_v12 = vpop.trf.xlu0 }
 0x337   :  { %1556 = vmatmul.mubr.msk.f32.vlgmr.msra.gmra.mxu1 %vm83_vm0, %v442_v12 }
 0x338   :  { %1571 = vmatpush3.msra.mxu1 %v412_v3 }
 0x339   :  { %1572 = vmatprep.subr.mxu1 %v411_v4 }
 0x33a   :  { %1573 = vmatpush3.msra.mxu1 %v411_v4  ;;  %v443_v13 = vpop.trf.xlu0  ;;  %v852_v4 = vpop.permute.xlu1 %851 }
 0x33b   :  { %1558 = vmatprep.mubr.msk.f32.mxu1 %vm83_vm0, %v443_v13 }
 0x33e   :  { %v444_v14 = vpop.trf.xlu0  ;;  %v949_v12 = vpop.permute.xlu1 %948 }
 0x33f   :  { %1559 = vmatmul.mubr.msk.f32.gmra.mxu1 %vm83_vm0, %v444_v14 }
 0x342   :  { %v445_v15 = vpop.trf.xlu0  ;;  %v954_v14 = vpop.permute.xlu1 %953 }
 0x343   :  { %1561 = vmatprep.mubr.msk.f32.mxu1 %vm83_vm0, %v445_v15 }
 0x346   :  { %v446_v16 = vpop.trf.xlu0 }
 0x347   :  { %1562 = vmatmul.mubr.msk.f32.gmra.mxu1 %vm83_vm0, %v446_v16 }
 0x34a   :  { %v447_v17 = vpop.trf.xlu0 }
 0x34b   :  { %1564 = vmatprep.mubr.msk.f32.mxu1 %vm83_vm0, %v447_v17 }
 0x34e   :  { %v448_v18 = vpop.trf.xlu0 }
 0x34f   :  { %1565 = vmatmul.mubr.msk.f32.gmra.mxu1 %vm83_vm0, %v448_v18  ;;  %v56_v18 = vld [vmem:[%s1952_s1 + $0x78] sm:$0xff] }
 0x352   :  { %v449_v19 = vpop.trf.xlu0 }
 0x353   :  { %1567 = vmatprep.mubr.msk.f32.mxu1 %vm83_vm0, %v449_v19 }
 0x356   :  { %v450_v21 = vpop.trf.xlu0 }
 0x357   :  { %1568 = vmatmul.mubr.msk.f32.gmra.mxu1 %vm83_vm0, %v450_v21 }
 0x358   :  { %1574 = vmatprep.mubr.msk.f32.mxu1 %vm83_vm0, %v45_v20  ;;  %v55_v20 = vld [vmem:[%s1952_s1 + $0x70] sm:$0xff] }
 0x35b   :  { %1575 = vmatmul.mubr.msk.f32.vlgmr.msra.gmra.mxu1 %vm83_vm0, %v46_v22 }
 0x35c   :  { %1581 = vmatprep.mubr.msk.f32.mxu1 %vm83_vm0, %v47_v23 }
 0x3df   :  { %v1548_v25 = vpop.f32.mrf.mxu0 }
 0x3e0   :  { %v571_v26 = vadd.f32 %v1548_v25, %v1373_v24 }
 0x3e1   :  { %v565_v27 = vpop.f32.mrf.mxu0 }
 0x3e2   :  { %646 = vst.msk [vmem:[#allocation2 + $0x8] sm:$0xff] %vm644_vm7, %v571_v26  ;;  %v566_v28 = vadd.f32 %v1373_v24, %v565_v27 }
 0x3e4   :  { %645 = vst.msk [vmem:[#allocation2] sm:$0xff] %vm644_vm7, %v566_v28 }
 0x3e7   :  { %v1551_v29 = vpop.f32.mrf.mxu0 }
 0x3e9   :  { %v1324_v30 = vld [vmem:[#allocation2 + $0x8] sm:$0xff]  ;;  %v575_v31 = vpop.f32.mrf.mxu0 }
 0x3ea   :  { %1325 = vst [vmem:[%s1956_s5 + $0x8] sm:$0xff] %v1324_v30 }
 0x3eb   :  { %v1322_v32 = vld [vmem:[#allocation2] sm:$0xff] }
 0x3ec   :  { %1323 = vst [vmem:[%s1956_s5] sm:$0xff] %v1322_v32 }
 0x3ef   :  { %v1554_v33 = vpop.f32.mrf.mxu0 }
 0x3f1   :  { %v585_v34 = vpop.f32.mrf.mxu0 }
 0x3f7   :  { %v1557_v35 = vpop.f32.mrf.mxu1 }
 0x3f9   :  { %v595_v36 = vpop.f32.mrf.mxu1 }
 0x3ff   :  { %v1560_v37 = vpop.f32.mrf.mxu1 }
 0x401   :  { %v605_v38 = vpop.f32.mrf.mxu1 }
 0x407   :  { %v1563_v39 = vpop.f32.mrf.mxu1 }
 0x409   :  { %v615_v40 = vpop.f32.mrf.mxu1 }
 0x40a   :  { %v1398_v40 = vld [vmem:[%s1954_s3 + $0x7] ss:$0 sm:$0xff] }
 0x40f   :  { %v1566_v41 = vpop.f32.mrf.mxu1 }
 0x411   :  { %v625_v42 = vpop.f32.mrf.mxu1 }
 0x417   :  { %v1569_v44 = vpop.f32.mrf.mxu1 }
 0x419   :  { %v635_v45 = vpop.f32.mrf.mxu1 }
 0x41b   :  { %v1576_v46 = vpop.f32.mrf.mxu1 }
 0x41c   :  { %v749_v47 = vadd.f32 %v1576_v46, %v669_v43 }
 0x41d   :  { %v743_v49 = vpop.f32.mrf.mxu1 }
 0x41e   :  { %v744_v50 = vadd.f32 %v743_v49, %v664_v48  ;;  %1577 = vmatprep.subr.mxu1 %v749_v47 }
 0x41f   :  { %1578 = vmatpush3.msra.mxu1 %v749_v47 }
 0x420   :  { %1579 = vmatprep.subr.mxu1 %v744_v50 }
 0x421   :  { %1580 = vmatpush3.msra.mxu1 %v744_v50 }
 0x422   :  { %1582 = vmatmul.mubr.msk.f32.vlgmr.msra.gmra.mxu1 %vm83_vm0, %v48_v51 }
 0x423   :  { %1588 = vmatprep.mubr.msk.f32.mxu1 %vm83_vm0, %v49_v52 }
 0x4e2   :  { %v1583_v54 = vpop.f32.mrf.mxu1 }
 0x4e3   :  { %v840_v55 = vadd.f32 %v1583_v54, %v760_v53 }
 0x4e4   :  { %v834_v57 = vpop.f32.mrf.mxu1 }
 0x4e5   :  { %v846_v58 = vmul.f32 0.01, %v840_v55  ;;  %v835_v59 = vadd.f32 %v834_v57, %v755_v56  ;;  %vm844_vm8 = vcmp.gt.f32.partialorder %v840_v55, 0.0 }
 0x4e7   :  { %v845_v60 = vmul.f32 0.01, %v835_v59  ;;  %v848_v61 = vsel %vm844_vm8, %v840_v55, %v846_v58  ;;  %vm843_vm9 = vcmp.gt.f32.partialorder %v835_v59, 0.0 }
 0x4e8   :  { %1584 = vmatprep.subr.mxu1 %v848_v61 }
 0x4e9   :  { %1585 = vmatpush3.msra.mxu1 %v848_v61  ;;  %v847_v62 = vsel %vm843_vm9, %v835_v59, %v845_v60 }
 0x4ea   :  { %1586 = vmatprep.subr.mxu1 %v847_v62 }
 0x4eb   :  { %1587 = vmatpush3.msra.mxu1 %v847_v62 }
 0x4ec   :  { %1589 = vmatmul.mubr.msk.f32.vlgmr.msra.gmra.mxu1 %vm83_vm0, %v50_v63 }
 0x4ed   :  { %1595 = vmatprep.mubr.msk.f32.mxu1 %vm83_vm0, %v51_v0 }
 0x5ac   :  { %v1590_v2 = vpop.f32.mrf.mxu1 }
 0x5ad   :  { %v937_v3 = vadd.f32 %v1590_v2, %v857_v1 }
 0x5ae   :  { %v931_v5 = vpop.f32.mrf.mxu1 }
 0x5af   :  { %v943_v6 = vmul.f32 0.01, %v937_v3  ;;  %v932_v7 = vadd.f32 %v931_v5, %v852_v4  ;;  %vm941_vm10 = vcmp.gt.f32.partialorder %v937_v3, 0.0 }
 0x5b1   :  { %v942_v8 = vmul.f32 0.01, %v932_v7  ;;  %v945_v9 = vsel %vm941_vm10, %v937_v3, %v943_v6  ;;  %vm940_vm11 = vcmp.gt.f32.partialorder %v932_v7, 0.0 }
 0x5b2   :  { %1591 = vmatprep.subr.mxu1 %v945_v9 }
 0x5b3   :  { %1592 = vmatpush3.msra.mxu1 %v945_v9  ;;  %v944_v10 = vsel %vm940_vm11, %v932_v7, %v942_v8 }
 0x5b4   :  { %1593 = vmatprep.subr.mxu1 %v944_v10 }
 0x5b5   :  { %1594 = vmatpush3.msra.mxu1 %v944_v10 }
 0x5b6   :  { %1596 = vmatmul.mubr.msk.f32.vlgmr.msra.gmra.mxu1 %vm83_vm0, %v52_v11  ;;  %1598 = vmatprep.subr.mxu1 %v56_v18 }
 0x5b7   :  { %1599 = vmatpush3.msra.mxu1 %v56_v18 }
 0x5b8   :  { %1600 = vmatprep.subr.mxu1 %v55_v20 }
 0x5b9   :  { %1601 = vmatpush3.msra.mxu1 %v55_v20 }
 0x676   :  { %v1597_v13 = vpop.f32.mrf.mxu1 }
 0x677   :  { %v1034_v16 = vadd.f32 %v1597_v13, %v954_v14 }
 0x678   :  { %v1028_v15 = vpop.f32.mrf.mxu1 }
 0x679   :  { %v1029_v17 = vadd.f32 %v1028_v15, %v949_v12  ;;  %v1040_v21 = vmul.f32 0.01, %v1034_v16  ;;  %vm1038_vm13 = vcmp.gt.f32.partialorder %v1034_v16, 0.0 }
 0x67b   :  { %v1039_v19 = vmul.f32 0.01, %v1029_v17  ;;  %vm1037_vm12 = vcmp.gt.f32.partialorder %v1029_v17, 0.0  ;;  %v1042_v23 = vsel %vm1038_vm13, %v1034_v16, %v1040_v21 }
 0x67d   :  { %v1041_v22 = vsel %vm1037_vm12, %v1029_v17, %v1039_v19 }
 0x67e   :  { %1049 = vxpose.xlu1.b32.start [1/2] (short) %v1041_v22, 128 }
 0x682   :  { %1050 = vxpose.xlu1.b32.end [2/2] (short) %v1042_v23, 128 }
 0x6fa   :  { %v1065_v24 = vpop.trf.xlu1 }
 0x6fb   :  { %1602 = vmatprep.mubr.msk.f32.mxu1 %vm83_vm0, %v1065_v24 }
 0x6fe   :  { %v1066_v25 = vpop.trf.xlu1 }
 0x6ff   :  { %1603 = vmatmul.mubr.msk.f32.vlgmr.msra.gmra.mxu1 %vm83_vm0, %v1066_v25 }
 0x702   :  { %v1067_v26 = vpop.trf.xlu1 }
 0x703   :  { %1605 = vmatprep.mubr.msk.f32.mxu1 %vm83_vm0, %v1067_v26 }
 0x706   :  { %v1068_v27 = vpop.trf.xlu1 }
 0x707   :  { %1606 = vmatmul.mubr.msk.f32.gmra.mxu1 %vm83_vm0, %v1068_v27 }
 0x70a   :  { %v1069_v28 = vpop.trf.xlu1 }
 0x70b   :  { %1608 = vmatprep.mubr.msk.f32.mxu1 %vm83_vm0, %v1069_v28 }
 0x70e   :  { %v1070_v29 = vpop.trf.xlu1 }
 0x70f   :  { %1609 = vmatmul.mubr.msk.f32.gmra.mxu1 %vm83_vm0, %v1070_v29 }
 0x712   :  { %v1071_v30 = vpop.trf.xlu1 }
 0x713   :  { %1611 = vmatprep.mubr.msk.f32.mxu1 %vm83_vm0, %v1071_v30 }
 0x716   :  { %v1072_v31 = vpop.trf.xlu1 }
 0x717   :  { %1612 = vmatmul.mubr.msk.f32.gmra.mxu1 %vm83_vm0, %v1072_v31 }
 0x71a   :  { %v1073_v32 = vpop.trf.xlu1 }
 0x71b   :  { %1614 = vmatprep.mubr.msk.f32.mxu1 %vm83_vm0, %v1073_v32 }
 0x71e   :  { %v1074_v33 = vpop.trf.xlu1 }
 0x71f   :  { %1615 = vmatmul.mubr.msk.f32.gmra.mxu1 %vm83_vm0, %v1074_v33 }
 0x722   :  { %v1075_v34 = vpop.trf.xlu1 }
 0x723   :  { %1617 = vmatprep.mubr.msk.f32.mxu1 %vm83_vm0, %v1075_v34 }
 0x726   :  { %v1076_v35 = vpop.trf.xlu1 }
 0x727   :  { %1618 = vmatmul.mubr.msk.f32.gmra.mxu1 %vm83_vm0, %v1076_v35 }
 0x72a   :  { %v1077_v36 = vpop.trf.xlu1 }
 0x72b   :  { %1620 = vmatprep.mubr.msk.f32.mxu1 %vm83_vm0, %v1077_v36 }
 0x72e   :  { %v1078_v37 = vpop.trf.xlu1 }
 0x72f   :  { %1621 = vmatmul.mubr.msk.f32.gmra.mxu1 %vm83_vm0, %v1078_v37 }
 0x732   :  { %v1079_v38 = vpop.trf.xlu1 }
 0x733   :  { %1623 = vmatprep.mubr.msk.f32.mxu1 %vm83_vm0, %v1079_v38 }
 0x736   :  { %v1080_v39 = vpop.trf.xlu1 }
 0x737   :  { %1624 = vmatmul.mubr.msk.f32.gmra.mxu1 %vm83_vm0, %v1080_v39 }
 0x7bf   :  { %v1604_v41 = vpop.f32.mrf.mxu1 }
 0x7c0   :  { %v1201_v42 = vadd.f32 %v1604_v41, %v1398_v40 }
 0x7c1   :  { %v1195_v43 = vpop.f32.mrf.mxu1 }
 0x7c2   :  { %1275 = vst.msk [vmem:[#allocation3 + $0x8] sm:$0xff] %vm83_vm0, %v1201_v42  ;;  %v1196_v44 = vadd.f32 %v1398_v40, %v1195_v43 }
 0x7c4   :  { %1274 = vst.msk [vmem:[#allocation3] sm:$0xff] %vm83_vm0, %v1196_v44 }
 0x7c7   :  { %v1607_v45 = vpop.f32.mrf.mxu1 }
 0x7c8   :  { %v1211_v46 = vadd.f32 %v1607_v45, %v1398_v40 }
 0x7c9   :  { %v1205_v47 = vpop.f32.mrf.mxu1 }
 0x7ca   :  { %1277 = vst.msk [vmem:[#allocation3 + $0x18] sm:$0xff] %vm83_vm0, %v1211_v46  ;;  %v1206_v48 = vadd.f32 %v1398_v40, %v1205_v47 }
 0x7cc   :  { %1276 = vst.msk [vmem:[#allocation3 + $0x10] sm:$0xff] %vm83_vm0, %v1206_v48 }
 0x7cf   :  { %v1610_v49 = vpop.f32.mrf.mxu1 }
 0x7d0   :  { %v1221_v50 = vadd.f32 %v1610_v49, %v1398_v40 }
 0x7d1   :  { %v1215_v51 = vpop.f32.mrf.mxu1 }
 0x7d2   :  { %1279 = vst.msk [vmem:[#allocation3 + $0x28] sm:$0xff] %vm83_vm0, %v1221_v50  ;;  %v1216_v52 = vadd.f32 %v1398_v40, %v1215_v51 }
 0x7d4   :  { %1278 = vst.msk [vmem:[#allocation3 + $0x20] sm:$0xff] %vm83_vm0, %v1216_v52 }
 0x7d7   :  { %v1613_v53 = vpop.f32.mrf.mxu1 }
 0x7d8   :  { %v1231_v54 = vadd.f32 %v1613_v53, %v1398_v40 }
 0x7d9   :  { %v1225_v55 = vpop.f32.mrf.mxu1 }
 0x7da   :  { %1281 = vst.msk [vmem:[#allocation3 + $0x38] sm:$0xff] %vm83_vm0, %v1231_v54  ;;  %v1226_v56 = vadd.f32 %v1398_v40, %v1225_v55 }
 0x7dc   :  { %1280 = vst.msk [vmem:[#allocation3 + $0x30] sm:$0xff] %vm83_vm0, %v1226_v56 }
 0x7df   :  { %v1616_v57 = vpop.f32.mrf.mxu1 }
 0x7e0   :  { %v1241_v58 = vadd.f32 %v1616_v57, %v1398_v40 }
 0x7e1   :  { %v1235_v59 = vpop.f32.mrf.mxu1 }
 0x7e2   :  { %1283 = vst.msk [vmem:[#allocation3 + $0x48] sm:$0xff] %vm83_vm0, %v1241_v58  ;;  %v1236_v60 = vadd.f32 %v1398_v40, %v1235_v59 }
 0x7e4   :  { %1282 = vst.msk [vmem:[#allocation3 + $0x40] sm:$0xff] %vm83_vm0, %v1236_v60 }
 0x7e7   :  { %v1619_v61 = vpop.f32.mrf.mxu1 }
 0x7e8   :  { %v1251_v62 = vadd.f32 %v1619_v61, %v1398_v40 }
 0x7e9   :  { %v1245_v63 = vpop.f32.mrf.mxu1 }
 0x7ea   :  { %1285 = vst.msk [vmem:[#allocation3 + $0x58] sm:$0xff] %vm83_vm0, %v1251_v62  ;;  %v1246_v0 = vadd.f32 %v1398_v40, %v1245_v63 }
 0x7ec   :  { %1284 = vst.msk [vmem:[#allocation3 + $0x50] sm:$0xff] %vm83_vm0, %v1246_v0 }
 0x7ef   :  { %v1622_v1 = vpop.f32.mrf.mxu1 }
 0x7f0   :  { %v1261_v2 = vadd.f32 %v1622_v1, %v1398_v40 }
 0x7f1   :  { %v1255_v3 = vpop.f32.mrf.mxu1 }
 0x7f2   :  { %1287 = vst.msk [vmem:[#allocation3 + $0x68] sm:$0xff] %vm83_vm0, %v1261_v2  ;;  %v1256_v4 = vadd.f32 %v1398_v40, %v1255_v3 }
 0x7f4   :  { %1286 = vst.msk [vmem:[#allocation3 + $0x60] sm:$0xff] %vm83_vm0, %v1256_v4 }
 0x7f7   :  { %v1625_v5 = vpop.f32.mrf.mxu1 }
 0x7f8   :  { %v1271_v6 = vadd.f32 %v1625_v5, %v1398_v40 }
 0x7f9   :  { %v1265_v7 = vpop.f32.mrf.mxu1 }
 0x7fa   :  { %1289 = vst.msk [vmem:[#allocation3 + $0x78] sm:$0xff] %vm83_vm0, %v1271_v6  ;;  %v1266_v8 = vadd.f32 %v1398_v40, %v1265_v7 }
 0x7fc   :  { %1288 = vst.msk [vmem:[#allocation3 + $0x70] sm:$0xff] %vm83_vm0, %v1266_v8 }
 0x7fd   :  { %1333 = vsyncadd [#allocation4], 1792  ;;  %s1660_s3 = smov [#allocation3]  }
 0x7fe   :  { %s1334_s21 = sshll.u32 %s1660_s3, 4  ;;  %s1335_s21 = int_to_ptr.vmem [resolvable:$true] %s1334_s21 }
 0x7ff   :  { %s1637_s22 = scalar_lea.vmem %s1335_s21, 256  ;;  %s1641_s23 = scalar_lea.vmem %s1335_s21, 2048 }
 0x800   :  { %p1638_p0 = scmp.ne.s32.totalorder %s1335_s21, %s1637_s22  ;;  %p1642_p1 = scmp.lt.s32.totalorder %s1335_s21, %s1335_s21 }
 0x801   :  { %p1643_p2 = scmp.lt.s32.totalorder %s1641_s23, %s1637_s22 }
 0x803   :  { %p1644_p3 = por %p1643_p2, %p1642_p1 }
 0x805   :  { %p1645_p4 = pnand %p1644_p3, %p1638_p0 }
 0x807   :  { %1648 = shalt.err (!%p1645_p4)
}
 0x808   :  { %s1661_s24 = smov 128   ;;  %s1662_s25 = smov 8  }
 0x809   :  { %1340 = dma.vmem_to_hbm [thread:$0]  %s1335_s21, 256, %s1957_s6, [#allocation4], %s1661_s24, %s1661_s24, %s1662_s25  }
 0x80a   :  { %1657 = dma.done.wait [#allocation4], 2048  }
 0x80b   :  { %1658 = vsyncadd [#allocation4], 4294965248 }
 0x80c   :  { %1346 = vsyncpa [#allocation4], 1 }

</bundles_post_ra>
